<compile_context>
chip_gen: v7x
topology: tpu7x:2x2x1
jax: 0.10.0
libtpu: 0.0.40
codegen_flags: <defaults>
</compile_context>

<pallas_src>
import functools

import jax
import jax.numpy as jnp
from jax import lax
from jax.experimental import pallas as pl
from jax.experimental.pallas import tpu as pltpu


def _multi_attention_kernel(x_ref, wqkv_ref, wp_ref, bp_ref, o_ref, att_sc,
                            *, n_head, head_dim):
    # x_ref:    (1, T, C)      current batch element
    # wqkv_ref: (C, 3*H*D)     fused [Wq | Wk | Wv] projection (scale folded into Wq)
    # wp_ref:   (C, C)         output projection weight, already transposed (in, out)
    # bp_ref:   (1, C)         output projection bias
    # o_ref:    (1, T, C)      output for current batch element
    # att_sc:   (T, C) VMEM    per-head attention outputs written in place (no concat)
    x = x_ref[0]                                    # (T, C)
    T = x.shape[0]
    HD = n_head * head_dim                          # = C

    # One big MXU matmul for all heads' Q, K, V at once.
    qkv = jnp.dot(x, wqkv_ref[...], preferred_element_type=jnp.float32)   # (T, 3*HD)

    # Causal (tril) mask built in-kernel. Large finite negative instead of -inf so an
    # all-masked row (never happens for causal, but robust) cannot produce NaN.
    row = lax.broadcasted_iota(jnp.int32, (T, T), 0)
    col = lax.broadcasted_iota(jnp.int32, (T, T), 1)
    causal = row >= col
    neg_big = jnp.float32(-1e30)

    for h in range(n_head):                         # static, small H; writes go straight
        lo = h * head_dim                           # to the slab so nothing stays live
        hi = lo + head_dim
        q = qkv[:, lo:hi]                           # (T, D); scale already in Wq
        k = qkv[:, HD + lo:HD + hi]                 # (T, D)
        v = qkv[:, 2 * HD + lo:2 * HD + hi]         # (T, D)

        s = jnp.dot(q, k.T, preferred_element_type=jnp.float32)   # (T, T)
        s = jnp.where(causal, s, neg_big)

        # numerically-stable softmax; reciprocal on the EUP (approx) instead of a divide
        m = jnp.max(s, axis=-1, keepdims=True)
        e = jnp.exp(s - m)
        inv = pl.reciprocal(jnp.sum(e, axis=-1, keepdims=True), approx=True)
        p = e * inv
        # dropout(p) -> identity (eval mode)

        att_sc[:, lo:hi] = jnp.dot(p, v, preferred_element_type=jnp.float32)

    # Output projection: y = concat @ Wp^T + b   (Wp already transposed host-side)
    y = jnp.dot(att_sc[...], wp_ref[...], preferred_element_type=jnp.float32) + bp_ref[0]
    # dropout(y) -> identity (eval mode)
    o_ref[0] = y.astype(o_ref.dtype)


def multi_attention(x, wq, wk, wv, wp, bp):
    """x: (B, T, C); wq/wk/wv: (H, C, D); wp: (C, C) (out, in); bp: (C,). Returns (B, T, C)."""
    B, T, C = x.shape
    H, _, D = wq.shape
    scale = C ** (-0.5)     # matches `* C ** (-0.5)` in the PyTorch module (C = embd_dim)

    # Host-side layout plumbing (free): stack per-head weights as (C, H*D), fuse Q|K|V
    # into a single (C, 3*H*D) operand, fold the softmax scale into Wq, pre-transpose Wp.
    def stack(w):                                   # (H, C, D) -> (C, H*D)
        return jnp.transpose(w, (1, 0, 2)).reshape(C, H * D)

    wqkv = jnp.concatenate([stack(wq) * scale, stack(wk), stack(wv)], axis=1)  # (C, 3HD)
    wp_t = wp.T                                     # (C_in, C_out)
    bp2 = bp.reshape(1, C)

    kernel = functools.partial(_multi_attention_kernel, n_head=H, head_dim=D)

    return pl.pallas_call(
        kernel,
        out_shape=jax.ShapeDtypeStruct((B, T, C), x.dtype),
        grid_spec=pltpu.PrefetchScalarGridSpec(
            num_scalar_prefetch=0,
            grid=(B,),
            in_specs=[
                pl.BlockSpec((1, T, C), lambda b: (b, 0, 0)),
                pl.BlockSpec((C, 3 * H * D), lambda b: (0, 0)),   # grid-invariant
                pl.BlockSpec((C, C), lambda b: (0, 0)),           # grid-invariant
                pl.BlockSpec((1, C), lambda b: (0, 0)),           # grid-invariant
            ],
            out_specs=pl.BlockSpec((1, T, C), lambda b: (b, 0, 0)),
            scratch_shapes=[pltpu.VMEM((T, H * D), jnp.float32)],
        ),
        compiler_params=pltpu.CompilerParams(
            dimension_semantics=("parallel",)),      # B>=2 -> both v7x TCs busy
    )(x, wqkv, wp_t, bp2)


def _reference(x, wq, wk, wv, wp, bp):
    # Pure-JAX reference mirroring the PyTorch forward (dropout = identity).
    B, T, C = x.shape
    scale = C ** (-0.5)
    q = jnp.einsum("btc,hcd->bhtd", x, wq)
    k = jnp.einsum("btc,hcd->bhtd", x, wk)
    v = jnp.einsum("btc,hcd->bhtd", x, wv)
    s = jnp.einsum("bhtd,bhsd->bhts", q, k) * scale
    mask = jnp.tril(jnp.ones((T, T), dtype=bool))
    s = jnp.where(mask, s, -jnp.inf)
    p = jax.nn.softmax(s, axis=-1)
    o = jnp.einsum("bhts,bhsd->bhtd", p, v)              # (B, H, T, D)
    o = jnp.transpose(o, (0, 2, 1, 3)).reshape(B, T, C)  # concat over heads
    return o @ wp.T + bp


if __name__ == "__main__":
    # Hyperparameters implied by the module's globals.
    embd_dim = 32
    context_size = 8
    n_head = 4
    head_dim = embd_dim // n_head
    B, T = 2, context_size  # T <= context_size

    key = jax.random.PRNGKey(0)
    kx, kq, kk, kv, kp, kb = jax.random.split(key, 6)

    x = jax.random.normal(kx, (B, T, embd_dim), dtype=jnp.float32)
    # Per-head Linear(embd_dim, head_dim, bias=False) weights, stored as (H, C, D).
    wq = jax.random.normal(kq, (n_head, embd_dim, head_dim), dtype=jnp.float32) * 0.1
    wk = jax.random.normal(kk, (n_head, embd_dim, head_dim), dtype=jnp.float32) * 0.1
    wv = jax.random.normal(kv, (n_head, embd_dim, head_dim), dtype=jnp.float32) * 0.1
    # Output projection Linear(embd_dim, embd_dim): weight (out, in), bias (out,).
    wp = jax.random.normal(kp, (embd_dim, embd_dim), dtype=jnp.float32) * 0.1
    bp = jax.random.normal(kb, (embd_dim,), dtype=jnp.float32) * 0.1

    out = multi_attention(x, wq, wk, wv, wp, bp)
    out = jax.block_until_ready(out)

    ref = _reference(x, wq, wk, wv, wp, bp)
    assert out.shape == (B, T, embd_dim)
    # Tolerance loosened slightly vs exact-f32 because the softmax denominator uses the
    # approximate EUP reciprocal; still tight enough to catch any structural error.
    assert jnp.allclose(out, ref, atol=2e-3, rtol=2e-3), "mismatch vs reference"

    print("KERNEL_OK")
</pallas_src>

<mosaic_0001>
module attributes {stable_mosaic.version = 11 : i64} {
  func.func @_multi_attention_kernel(%arg0: i32, %arg1: memref<1x8x32xf32, #tpu.memory_space<vmem>>, %arg2: memref<32x96xf32, #tpu.memory_space<vmem>>, %arg3: memref<32x32xf32, #tpu.memory_space<vmem>>, %arg4: memref<1x32xf32, #tpu.memory_space<vmem>>, %arg5: memref<1x8x32xf32, #tpu.memory_space<vmem>>, %arg6: memref<8x32xf32, #tpu.memory_space<vmem>>) attributes {dimension_semantics = [#tpu.dimension_semantics<parallel>], iteration_bounds = array<i64: 2>, scalar_prefetch = 0 : i64, scratch_operands = 1 : i64, tpu.core_type = #tpu.core_type<tc>, window_params = [{transform_indices = @transform_0, window_bounds = array<i64: 1, 8, 32>}, {pipeline_mode = #tpu.pipeline_mode<synchronous>, transform_indices = @transform_1, window_bounds = array<i64: 32, 96>}, {pipeline_mode = #tpu.pipeline_mode<synchronous>, transform_indices = @transform_2, window_bounds = array<i64: 32, 32>}, {pipeline_mode = #tpu.pipeline_mode<synchronous>, transform_indices = @transform_3, window_bounds = array<i64: 1, 32>}, {transform_indices = @transform_4, window_bounds = array<i64: 1, 8, 32>}]} {
    %c0 = arith.constant 0 : index
    %c0_0 = arith.constant 0 : index
    %c0_1 = arith.constant 0 : index
    %0 = vector.load %arg1[%c0, %c0_0, %c0_1] : memref<1x8x32xf32, #tpu.memory_space<vmem>>, vector<1x8x32xf32>
    %1 = vector.shape_cast %0 : vector<1x8x32xf32> to vector<8x32xf32>
    %c0_2 = arith.constant 0 : index
    %c0_3 = arith.constant 0 : index
    %2 = vector.load %arg2[%c0_2, %c0_3] : memref<32x96xf32, #tpu.memory_space<vmem>>, vector<32x96xf32>
    %cst = arith.constant dense<0.000000e+00> : vector<8x96xf32>
    %3 = tpu.matmul %1, %2, %cst {dimension_numbers = #tpu.dot_dimension_numbers<[1], [0], [0], [1], [0, 0, 1, 1], [], []>} : vector<8x32xf32>, vector<32x96xf32>, vector<8x96xf32> -> vector<8x96xf32>
    %4 = tpu.iota {dimensions = array<i32: 0>} : vector<8x8xi32>
    %5 = tpu.iota {dimensions = array<i32: 1>} : vector<8x8xi32>
    %6 = arith.cmpi sge, %4, %5 : vector<8x8xi32>
    %7 = vector.extract_strided_slice %3 {offsets = [0, 0], sizes = [8, 8], strides = [1, 1]} : vector<8x96xf32> to vector<8x8xf32>
    %8 = vector.extract_strided_slice %3 {offsets = [0, 32], sizes = [8, 8], strides = [1, 1]} : vector<8x96xf32> to vector<8x8xf32>
    %9 = vector.extract_strided_slice %3 {offsets = [0, 64], sizes = [8, 8], strides = [1, 1]} : vector<8x96xf32> to vector<8x8xf32>
    %10 = tpu.transpose %8, [1, 0] : vector<8x8xf32> -> vector<8x8xf32>
    %cst_4 = arith.constant dense<0.000000e+00> : vector<8x8xf32>
    %11 = tpu.matmul %7, %10, %cst_4 {dimension_numbers = #tpu.dot_dimension_numbers<[1], [0], [0], [1], [0, 0, 1, 1], [], []>} : vector<8x8xf32>, vector<8x8xf32>, vector<8x8xf32> -> vector<8x8xf32>
    %cst_5 = arith.constant -1.000000e+30 : f32
    %12 = vector.broadcast %cst_5 : f32 to vector<8x8xf32>
    %13 = arith.select %6, %11, %12 : vector<8x8xi1>, vector<8x8xf32>
    %cst_6 = arith.constant dense<0xFF800000> : vector<8xf32>
    %14 = vector.multi_reduction <maximumf>, %13, %cst_6 [1] : vector<8x8xf32> to vector<8xf32>
    %15 = vector.shape_cast %14 : vector<8xf32> to vector<8x1xf32>
    %16 = vector.broadcast %15 : vector<8x1xf32> to vector<8x8xf32>
    %17 = arith.subf %13, %16 : vector<8x8xf32>
    %18 = math.exp %17 : vector<8x8xf32>
    %cst_7 = arith.constant dense<0.000000e+00> : vector<8xf32>
    %19 = vector.multi_reduction <add>, %18, %cst_7 [1] : vector<8x8xf32> to vector<8xf32>
    %20 = vector.shape_cast %19 : vector<8xf32> to vector<8x1xf32>
    %21 = tpu.reciprocal %20 {approx = true} : vector<8x1xf32> -> vector<8x1xf32>
    %22 = vector.broadcast %21 : vector<8x1xf32> to vector<8x8xf32>
    %23 = arith.mulf %18, %22 : vector<8x8xf32>
    %cst_8 = arith.constant dense<0.000000e+00> : vector<8x8xf32>
    %24 = tpu.matmul %23, %9, %cst_8 {dimension_numbers = #tpu.dot_dimension_numbers<[1], [0], [0], [1], [0, 0, 1, 1], [], []>} : vector<8x8xf32>, vector<8x8xf32>, vector<8x8xf32> -> vector<8x8xf32>
    %c0_9 = arith.constant 0 : index
    %c0_10 = arith.constant 0 : index
    %25 = vector.load %arg6[%c0_9, %c0_10] : memref<8x32xf32, #tpu.memory_space<vmem>>, vector<8x8xf32>
    tpu.vector_store %arg6[%c0_9, %c0_10], %24 {strides = array<i32>} : memref<8x32xf32, #tpu.memory_space<vmem>>, vector<8x8xf32>,
    %26 = vector.extract_strided_slice %3 {offsets = [0, 8], sizes = [8, 8], strides = [1, 1]} : vector<8x96xf32> to vector<8x8xf32>
    %27 = vector.extract_strided_slice %3 {offsets = [0, 40], sizes = [8, 8], strides = [1, 1]} : vector<8x96xf32> to vector<8x8xf32>
    %28 = vector.extract_strided_slice %3 {offsets = [0, 72], sizes = [8, 8], strides = [1, 1]} : vector<8x96xf32> to vector<8x8xf32>
    %29 = tpu.transpose %27, [1, 0] : vector<8x8xf32> -> vector<8x8xf32>
    %cst_11 = arith.constant dense<0.000000e+00> : vector<8x8xf32>
    %30 = tpu.matmul %26, %29, %cst_11 {dimension_numbers = #tpu.dot_dimension_numbers<[1], [0], [0], [1], [0, 0, 1, 1], [], []>} : vector<8x8xf32>, vector<8x8xf32>, vector<8x8xf32> -> vector<8x8xf32>
    %cst_12 = arith.constant -1.000000e+30 : f32
    %31 = vector.broadcast %cst_12 : f32 to vector<8x8xf32>
    %32 = arith.select %6, %30, %31 : vector<8x8xi1>, vector<8x8xf32>
    %cst_13 = arith.constant dense<0xFF800000> : vector<8xf32>
    %33 = vector.multi_reduction <maximumf>, %32, %cst_13 [1] : vector<8x8xf32> to vector<8xf32>
    %34 = vector.shape_cast %33 : vector<8xf32> to vector<8x1xf32>
    %35 = vector.broadcast %34 : vector<8x1xf32> to vector<8x8xf32>
    %36 = arith.subf %32, %35 : vector<8x8xf32>
    %37 = math.exp %36 : vector<8x8xf32>
    %cst_14 = arith.constant dense<0.000000e+00> : vector<8xf32>
    %38 = vector.multi_reduction <add>, %37, %cst_14 [1] : vector<8x8xf32> to vector<8xf32>
    %39 = vector.shape_cast %38 : vector<8xf32> to vector<8x1xf32>
    %40 = tpu.reciprocal %39 {approx = true} : vector<8x1xf32> -> vector<8x1xf32>
    %41 = vector.broadcast %40 : vector<8x1xf32> to vector<8x8xf32>
    %42 = arith.mulf %37, %41 : vector<8x8xf32>
    %cst_15 = arith.constant dense<0.000000e+00> : vector<8x8xf32>
    %43 = tpu.matmul %42, %28, %cst_15 {dimension_numbers = #tpu.dot_dimension_numbers<[1], [0], [0], [1], [0, 0, 1, 1], [], []>} : vector<8x8xf32>, vector<8x8xf32>, vector<8x8xf32> -> vector<8x8xf32>
    %c0_16 = arith.constant 0 : index
    %c8 = arith.constant 8 : index
    %44 = vector.load %arg6[%c0_16, %c8] : memref<8x32xf32, #tpu.memory_space<vmem>>, vector<8x8xf32>
    tpu.vector_store %arg6[%c0_16, %c8], %43 {strides = array<i32>} : memref<8x32xf32, #tpu.memory_space<vmem>>, vector<8x8xf32>,
    %45 = vector.extract_strided_slice %3 {offsets = [0, 16], sizes = [8, 8], strides = [1, 1]} : vector<8x96xf32> to vector<8x8xf32>
    %46 = vector.extract_strided_slice %3 {offsets = [0, 48], sizes = [8, 8], strides = [1, 1]} : vector<8x96xf32> to vector<8x8xf32>
    %47 = vector.extract_strided_slice %3 {offsets = [0, 80], sizes = [8, 8], strides = [1, 1]} : vector<8x96xf32> to vector<8x8xf32>
    %48 = tpu.transpose %46, [1, 0] : vector<8x8xf32> -> vector<8x8xf32>
    %cst_17 = arith.constant dense<0.000000e+00> : vector<8x8xf32>
    %49 = tpu.matmul %45, %48, %cst_17 {dimension_numbers = #tpu.dot_dimension_numbers<[1], [0], [0], [1], [0, 0, 1, 1], [], []>} : vector<8x8xf32>, vector<8x8xf32>, vector<8x8xf32> -> vector<8x8xf32>
    %cst_18 = arith.constant -1.000000e+30 : f32
    %50 = vector.broadcast %cst_18 : f32 to vector<8x8xf32>
    %51 = arith.select %6, %49, %50 : vector<8x8xi1>, vector<8x8xf32>
    %cst_19 = arith.constant dense<0xFF800000> : vector<8xf32>
    %52 = vector.multi_reduction <maximumf>, %51, %cst_19 [1] : vector<8x8xf32> to vector<8xf32>
    %53 = vector.shape_cast %52 : vector<8xf32> to vector<8x1xf32>
    %54 = vector.broadcast %53 : vector<8x1xf32> to vector<8x8xf32>
    %55 = arith.subf %51, %54 : vector<8x8xf32>
    %56 = math.exp %55 : vector<8x8xf32>
    %cst_20 = arith.constant dense<0.000000e+00> : vector<8xf32>
    %57 = vector.multi_reduction <add>, %56, %cst_20 [1] : vector<8x8xf32> to vector<8xf32>
    %58 = vector.shape_cast %57 : vector<8xf32> to vector<8x1xf32>
    %59 = tpu.reciprocal %58 {approx = true} : vector<8x1xf32> -> vector<8x1xf32>
    %60 = vector.broadcast %59 : vector<8x1xf32> to vector<8x8xf32>
    %61 = arith.mulf %56, %60 : vector<8x8xf32>
    %cst_21 = arith.constant dense<0.000000e+00> : vector<8x8xf32>
    %62 = tpu.matmul %61, %47, %cst_21 {dimension_numbers = #tpu.dot_dimension_numbers<[1], [0], [0], [1], [0, 0, 1, 1], [], []>} : vector<8x8xf32>, vector<8x8xf32>, vector<8x8xf32> -> vector<8x8xf32>
    %c0_22 = arith.constant 0 : index
    %c16 = arith.constant 16 : index
    %63 = vector.load %arg6[%c0_22, %c16] : memref<8x32xf32, #tpu.memory_space<vmem>>, vector<8x8xf32>
    tpu.vector_store %arg6[%c0_22, %c16], %62 {strides = array<i32>} : memref<8x32xf32, #tpu.memory_space<vmem>>, vector<8x8xf32>,
    %64 = vector.extract_strided_slice %3 {offsets = [0, 24], sizes = [8, 8], strides = [1, 1]} : vector<8x96xf32> to vector<8x8xf32>
    %65 = vector.extract_strided_slice %3 {offsets = [0, 56], sizes = [8, 8], strides = [1, 1]} : vector<8x96xf32> to vector<8x8xf32>
    %66 = vector.extract_strided_slice %3 {offsets = [0, 88], sizes = [8, 8], strides = [1, 1]} : vector<8x96xf32> to vector<8x8xf32>
    %67 = tpu.transpose %65, [1, 0] : vector<8x8xf32> -> vector<8x8xf32>
    %cst_23 = arith.constant dense<0.000000e+00> : vector<8x8xf32>
    %68 = tpu.matmul %64, %67, %cst_23 {dimension_numbers = #tpu.dot_dimension_numbers<[1], [0], [0], [1], [0, 0, 1, 1], [], []>} : vector<8x8xf32>, vector<8x8xf32>, vector<8x8xf32> -> vector<8x8xf32>
    %cst_24 = arith.constant -1.000000e+30 : f32
    %69 = vector.broadcast %cst_24 : f32 to vector<8x8xf32>
    %70 = arith.select %6, %68, %69 : vector<8x8xi1>, vector<8x8xf32>
    %cst_25 = arith.constant dense<0xFF800000> : vector<8xf32>
    %71 = vector.multi_reduction <maximumf>, %70, %cst_25 [1] : vector<8x8xf32> to vector<8xf32>
    %72 = vector.shape_cast %71 : vector<8xf32> to vector<8x1xf32>
    %73 = vector.broadcast %72 : vector<8x1xf32> to vector<8x8xf32>
    %74 = arith.subf %70, %73 : vector<8x8xf32>
    %75 = math.exp %74 : vector<8x8xf32>
    %cst_26 = arith.constant dense<0.000000e+00> : vector<8xf32>
    %76 = vector.multi_reduction <add>, %75, %cst_26 [1] : vector<8x8xf32> to vector<8xf32>
    %77 = vector.shape_cast %76 : vector<8xf32> to vector<8x1xf32>
    %78 = tpu.reciprocal %77 {approx = true} : vector<8x1xf32> -> vector<8x1xf32>
    %79 = vector.broadcast %78 : vector<8x1xf32> to vector<8x8xf32>
    %80 = arith.mulf %75, %79 : vector<8x8xf32>
    %cst_27 = arith.constant dense<0.000000e+00> : vector<8x8xf32>
    %81 = tpu.matmul %80, %66, %cst_27 {dimension_numbers = #tpu.dot_dimension_numbers<[1], [0], [0], [1], [0, 0, 1, 1], [], []>} : vector<8x8xf32>, vector<8x8xf32>, vector<8x8xf32> -> vector<8x8xf32>
    %c0_28 = arith.constant 0 : index
    %c24 = arith.constant 24 : index
    %82 = vector.load %arg6[%c0_28, %c24] : memref<8x32xf32, #tpu.memory_space<vmem>>, vector<8x8xf32>
    tpu.vector_store %arg6[%c0_28, %c24], %81 {strides = array<i32>} : memref<8x32xf32, #tpu.memory_space<vmem>>, vector<8x8xf32>,
    %c0_29 = arith.constant 0 : index
    %c0_30 = arith.constant 0 : index
    %83 = vector.load %arg6[%c0_29, %c0_30] : memref<8x32xf32, #tpu.memory_space<vmem>>, vector<8x32xf32>
    %c0_31 = arith.constant 0 : index
    %c0_32 = arith.constant 0 : index
    %84 = vector.load %arg3[%c0_31, %c0_32] : memref<32x32xf32, #tpu.memory_space<vmem>>, vector<32x32xf32>
    %cst_33 = arith.constant dense<0.000000e+00> : vector<8x32xf32>
    %85 = tpu.matmul %83, %84, %cst_33 {dimension_numbers = #tpu.dot_dimension_numbers<[1], [0], [0], [1], [0, 0, 1, 1], [], []>} : vector<8x32xf32>, vector<32x32xf32>, vector<8x32xf32> -> vector<8x32xf32>
    %c0_34 = arith.constant 0 : index
    %c0_35 = arith.constant 0 : index
    %86 = vector.load %arg4[%c0_34, %c0_35] : memref<1x32xf32, #tpu.memory_space<vmem>>, vector<1x32xf32>
    %87 = vector.shape_cast %86 : vector<1x32xf32> to vector<32xf32>
    %88 = vector.shape_cast %87 : vector<32xf32> to vector<1x32xf32>
    %89 = vector.broadcast %88 : vector<1x32xf32> to vector<8x32xf32>
    %90 = arith.addf %85, %89 : vector<8x32xf32>
    %c0_36 = arith.constant 0 : index
    %c0_37 = arith.constant 0 : index
    %c0_38 = arith.constant 0 : index
    %91 = vector.load %arg5[%c0_36, %c0_37, %c0_38] : memref<1x8x32xf32, #tpu.memory_space<vmem>>, vector<1x8x32xf32>
    %92 = vector.shape_cast %91 : vector<1x8x32xf32> to vector<8x32xf32>
    %93 = vector.shape_cast %90 : vector<8x32xf32> to vector<1x8x32xf32>
    tpu.vector_store %arg5[%c0_36, %c0_37, %c0_38], %93 {strides = array<i32>} : memref<1x8x32xf32, #tpu.memory_space<vmem>>, vector<1x8x32xf32>,
    return
  }
  func.func @transform_0(%arg0: i32) -> (i32, i32, i32) {
    %c0_i32 = arith.constant 0 : i32
    %c0_i32_0 = arith.constant 0 : i32
    %c0_i32_1 = arith.constant 0 : i32
    return %arg0, %c0_i32, %c0_i32_0 : i32, i32, i32
  }
  func.func @transform_1(%arg0: i32) -> (i32, i32) {
    %c0_i32 = arith.constant 0 : i32
    %c0_i32_0 = arith.constant 0 : i32
    %c0_i32_1 = arith.constant 0 : i32
    return %c0_i32, %c0_i32_0 : i32, i32
  }
  func.func @transform_2(%arg0: i32) -> (i32, i32) {
    %c0_i32 = arith.constant 0 : i32
    %c0_i32_0 = arith.constant 0 : i32
    %c0_i32_1 = arith.constant 0 : i32
    return %c0_i32, %c0_i32_0 : i32, i32
  }
  func.func @transform_3(%arg0: i32) -> (i32, i32) {
    %c0_i32 = arith.constant 0 : i32
    %c0_i32_0 = arith.constant 0 : i32
    %c0_i32_1 = arith.constant 0 : i32
    return %c0_i32, %c0_i32_0 : i32, i32
  }
  func.func @transform_4(%arg0: i32) -> (i32, i32, i32) {
    %c0_i32 = arith.constant 0 : i32
    %c0_i32_0 = arith.constant 0 : i32
    %c0_i32_1 = arith.constant 0 : i32
    return %arg0, %c0_i32, %c0_i32_0 : i32, i32, i32
  }
}

</mosaic_0001>

<bundles_post_ra>
// kernel: tpu_custom_call.1
= control target key start
LH: loop header
LB: loop body
LE: loop exit
PB: predicated region body
PF: predicated region fallthrough
CT: control target
= control target key end

     0   :  { %9 = vsyncpa [#allocation4], 0  ;;  %s1947_s0 = inlined_call_operand.hbm [shape: f32[2,8,32], index: 0, kind: input, shape index: {}]   ;;  %s1948_s1 = inlined_call_operand.hbm [shape: f32[32,96], index: 1, kind: input, shape index: {}]   ;;  %s1949_s2 = inlined_call_operand.hbm [shape: f32[32,32], index: 2, kind: input, shape index: {}]   ;;  %s1950_s3 = inlined_call_operand.vmem [shape: f32[1,32], index: 3, kind: input, shape index: {}]   ;;  %s1951_s4 = inlined_call_operand.hbm [shape: f32[2,8,32], index: 4, kind: output, shape index: {}]  }
   0x1   :  { %11 = vsyncpa [#allocation4 + $0x1], 0 }
   0x2   :  { %12 = vsyncpa [#allocation7], 0 }
   0x3   :  { %13 = vsyncpa [#allocation5], 0 }
   0x4   :  { %15 = vsyncpa [#allocation5 + $0x1], 0  ;;  %s1637_s15 = smov 0   ;;  %s1639_s16 = smov 0  }
   0x5   :  { %s1641_s17 = smov 0   ;;  %s1643_s18 = smov 0  }
   0x6 LB: > { %s1658_s19 = sadd.s32 4294967295, %s1587_s18   ;;  %s1198_s20 = sadd.s32 4294967294, %s1587_s18   ;;  %s1587_s18 = sphi %s1643_s18, %s1971_s18   ;;  %s1583_s17 = sphi %s1641_s17, %s1970_s17   ;;  %s1579_s16 = sphi %s1639_s16, %s1969_s16   ;;  %s1575_s15 = sphi %s1637_s15, %s1968_s15  }
   0x7   : > { %p41_p0 = scmp.ne.s32.totalorder %s1579_s16, %s1575_s15  ;;  %p1952_p1 = scmp.eq.s32.totalorder %s1658_s19, 0 }
   0x8   : > { %p134_p3 = scmp.eq.s32.totalorder %s1198_s20, 1  ;;  %p1199_p5 = scmp.ge.s32.totalorder %s1587_s18, 1 }
   0x9   : > { %p1667_p4 = por %p1952_p1, %p41_p0  ;;  %p141_p7 = scmp.lt.s32.totalorder %s1587_s18, 3 }
   0xa   : > { %p1672_p6 = por %p134_p3, %p41_p0  ;;  %s1589_s24 = smov [#allocation6]  }
   0xb   : > { %s1955_s21 = scalar_select %p1667_p4, 1, 0 }
   0xc   : > { %s1956_s22 = scalar_select %p1672_p6, 1, 0 }
   0xd   : > { %p1677_p8 = pnand %p1199_p5, %p141_p7  ;;  %s153_s25 = sshll.u32 %s1589_s24, 4  ;;  %s1681_s25 = int_to_ptr.vmem [resolvable:$true] %s153_s25 }
   0xe   : > { %s1590_s27 = smov [#allocation8]   ;;  %s1431_s5 = scalar_lea.hbm %s1948_s1, 512 }
   0xf   : > { %p1341_p9 = pneg %p1677_p8  ;;  %s166_s28 = sshll.u32 %s1590_s27, 4  ;;  %s1692_s28 = int_to_ptr.vmem [resolvable:$true] %s166_s28 }
  0x10   : > { %p1432_p12 = scmp.ne.s32.totalorder %s1948_s1, %s1431_s5  ;;  %p1438_p5 = scmp.lt.u32.totalorder %s1431_s5, %s1948_s1 }
  0x11   : > { %p1688_p11 = pnand %p1341_p9, %p1952_p1 }
  0x13   : > { %p1433_p13 = pneg %p1688_p11 }
  0x15   : > { %p1434_p0 = pnand %p1433_p13, %p1432_p12 }
  0x17   : > { %p1435_p3 = pneg %p1434_p0 }
  0x19   : > { %p1440_p7 = pnand %p1438_p5, %p1435_p3 }
  0x1b   : > { %1443 = shalt.err (!%p1440_p7)
}
  0x1c   : > { %s1444_s10 = scalar_lea.vmem %s1681_s25, 512  ;;  %p1452_p2 = scmp.lt.s32.totalorder %s1681_s25, %s1681_s25 }
  0x1d   : > { %p1445_p9 = scmp.ne.s32.totalorder %s1681_s25, %s1444_s10  ;;  %p1453_p12 = scmp.lt.s32.totalorder %s1444_s10, %s1444_s10 }
  0x1f   : > { %p1447_p10 = pnand %p1445_p9, %p1433_p13  ;;  %p1454_p0 = por %p1453_p12, %p1452_p2 }
  0x21   : > { %p1448_p1 = pneg %p1447_p10 }
  0x23   : > { %p1455_p6 = pnand %p1454_p0, %p1448_p1 }
  0x25   : > { %1458 = shalt.err (!%p1455_p6)
}
  0x26   : > { %s1591_s11 = smov 128   ;;  %s1592_s12 = smov 8  }
  0x27   : > { %1344 = dma.hbm_to_vmem [thread:$0]  (!%p1688_p11), %s1948_s1, 512, %s1681_s25, [#allocation7], %s1591_s11, %s1591_s11, %s1592_s12  }
  0x28   : > { %s1459_s27 = scalar_lea.hbm %s1949_s2, 512 }
  0x29   : > { %p1460_p2 = scmp.ne.s32.totalorder %s1949_s2, %s1459_s27  ;;  %p1466_p10 = scmp.lt.u32.totalorder %s1459_s27, %s1949_s2 }
  0x2b   : > { %p1462_p1 = pnand %p1460_p2, %p1433_p13 }
  0x2d   : > { %p1463_p6 = pneg %p1462_p1 }
  0x2f   : > { %p1468_p3 = pnand %p1466_p10, %p1463_p6 }
  0x31   : > { %1471 = shalt.err (!%p1468_p3)
}
  0x32   : > { %s1472_s25 = scalar_lea.vmem %s1692_s28, 512  ;;  %p1480_p12 = scmp.lt.s32.totalorder %s1692_s28, %s1692_s28 }
  0x33   : > { %p1473_p5 = scmp.ne.s32.totalorder %s1692_s28, %s1472_s25  ;;  %p1481_p0 = scmp.lt.s32.totalorder %s1472_s25, %s1472_s25 }
  0x35   : > { %p1475_p7 = pnand %p1473_p5, %p1433_p13  ;;  %p1482_p2 = por %p1481_p0, %p1480_p12 }
  0x37   : > { %p1476_p9 = pneg %p1475_p7 }
  0x39   : > { %p1483_p1 = pnand %p1482_p2, %p1476_p9 }
  0x3b   : > { %1486 = shalt.err (!%p1483_p1)
}
  0x3c   : > { %1347 = dma.hbm_to_vmem [thread:$0]  (!%p1688_p11), %s1949_s2, 512, %s1692_s28, [#allocation7], %s1591_s11, %s1591_s11, %s1592_s12  }
  0x3d   : > { %s1747_s9 = sadd.s32 1, %s1587_s18   ;;  %s28_s26 = sadd.s32 1, %s1583_s17 }
  0x3e   : > { %s25_s10 = ssub.s32 %s1587_s18, %s1747_s9  ;;  %p35_p13 = scmp.ne.s32.totalorder %s1583_s17, %s1579_s16 }
  0x3f   : > { %p26_p6 = scmp.eq.s32.totalorder %s25_s10, 0  ;;  %p36_p10 = scmp.eq.s32.totalorder %s1587_s18, 0 }
  0x40   : > { %p1959_p3 = scmp.eq.s32.totalorder %s1658_s19, 1  ;;  %p1358_p7 = scmp.lt.s32.totalorder %s1587_s18, 2 }
  0x41   : > { %s1763_s14 = scalar_select %p26_p6, %s1583_s17, %s28_s26  }
  0x42   : > { %p1757_p5 = por %p1959_p3, %p35_p13  ;;  %p37_p9 = por %p36_p10, %p35_p13 }
  0x43   : > { %s183_s20 = sand.u32 1, %s1583_s17   ;;  %s1204_s28 = sshll.u32 %s1587_s18, 7 }
  0x44   : > { %s1960_s13 = scalar_select %p1757_p5, 1, 0 }
  0x45   : > { %s1203_s24 = sshll.u32 %s183_s20, 3  ;;  %s1770_s27 = scalar_lea.hbm %s1947_s0, %s1204_s28 }
  0x46   : > { %s187_s29 = scalar_lea.vmem [#allocation3], %s1203_s24  ;;  %p1774_p11 = pnand %p1358_p7, %p37_p9 }
  0x47   : > { %s194_s30 = sshll.u32 %s187_s29, 4  ;;  %s184_s6 = scalar_lea.sflag [#allocation4], %s183_s20  ;;  %s1772_s30 = int_to_ptr.vmem [resolvable:$true] %s194_s30 }
  0x48   : > { %s1487_s25 = scalar_lea.hbm %s1770_s27, 128  ;;  %p1489_p0 = pneg %p1774_p11 }
  0x49   : > { %p1488_p12 = scmp.ne.s32.totalorder %s1770_s27, %s1487_s25  ;;  %s1492_s26 = scalar_lea.hbm %s1947_s0, 256 }
  0x4a   : > { %p1493_p13 = scmp.lt.u32.totalorder %s1770_s27, %s1947_s0  ;;  %p1494_p6 = scmp.lt.u32.totalorder %s1492_s26, %s1487_s25 }
  0x4b   : > { %p1490_p2 = pnand %p1489_p0, %p1488_p12  ;;  %p1496_p3 = scmp.lt.u32.totalorder %s1487_s25, %s1770_s27 }
  0x4c   : > { %p1495_p10 = por %p1494_p6, %p1493_p13 }
  0x4d   : > { %p1491_p1 = pneg %p1490_p2 }
  0x4e   : > { %p1497_p7 = por %p1496_p3, %p1495_p10 }
  0x50   : > { %p1498_p9 = pnand %p1497_p7, %p1491_p1 }
  0x52   : > { %1501 = shalt.err (!%p1498_p9)
}
  0x53   : > { %s1502_s20 = scalar_lea.vmem %s1772_s30, 128  ;;  %s1593_s28 = smov [#allocation3]  }
  0x54   : > { %p1503_p12 = scmp.ne.s32.totalorder %s1772_s30, %s1502_s20  ;;  %s1507_s11 = sshll.u32 %s1593_s28, 4  ;;  %s1508_s11 = int_to_ptr.vmem [resolvable:$false] %s1507_s11 }
  0x55   : > { %s1509_s12 = scalar_lea.vmem %s1508_s11, 256  ;;  %p1510_p4 = scmp.lt.s32.totalorder %s1772_s30, %s1508_s11 }
  0x56   : > { %p1505_p2 = pnand %p1503_p12, %p1489_p0  ;;  %p1511_p13 = scmp.lt.s32.totalorder %s1509_s12, %s1502_s20 }
  0x58   : > { %p1506_p5 = pneg %p1505_p2  ;;  %p1512_p6 = por %p1511_p13, %p1510_p4 }
  0x5a   : > { %p1513_p10 = pnand %p1512_p6, %p1506_p5 }
  0x5c   : > { %1516 = shalt.err (!%p1513_p10)
}
  0x5d   : > { %1351 = dma.hbm_to_vmem [thread:$0]  (!%p1774_p11), %s1770_s27, 128, %s1772_s30, %s184_s6  }
  0x5e   : > { %203 = sbr.rel (%p1677_p8) target bundleno = 2114 (0x842), region = 36  ;;  %s1806_s29 = sand.u32 (!%p1677_p8), 1, %s1579_s16  }
  0x5f   : > { %s1206_s25 = sshll.u32 (!%p1677_p8), %s1806_s29, 3  ;;  %s206_s7 = scalar_lea.sflag (!%p1677_p8), [#allocation4], %s1806_s29 }
  0x60   : > { %s209_s8 = scalar_lea.vmem (!%p1677_p8), [#allocation3], %s1206_s25  ;;  %p1962_p4 = scmp.ne.s32.totalorder (!%p1677_p8), %s1955_s21, 0 }
  0x65   : > { %1562 = dma.done.wait (%p1962_p4), %s206_s7, 128  }
  0x66   : > { %1564 = vsyncadd (%p1962_p4), %s206_s7, 4294967168  ;;  %p1963_p5 = scmp.eq.s32.totalorder %s1658_s19, 0 }
  0x68   : > { %1566 = dma.done.wait (%p1963_p5), [#allocation7], 1024   ;;  %p1964_p8 = pmov %p1963_p5 }
  0x69   : > { %v1594_v0 = vmov 0.0|0.0   ;;  %vm1595_vm0 = vmmov 0   ;;  %v1596_v1 = vmov 0.0   ;;  %v243_v2 = vld [vmem:[#allocation6] sm:$0xff]  ;;  %v244_v3 = vld [vmem:[#allocation6 + $0x8] sm:$0xff]  ;;  %v245_v4 = vld [vmem:[#allocation6 + $0x10] sm:$0xff]  ;;  %v321_v16 = vlaneseq }
  0x6a   : > { %1568 = vsyncadd (%p1964_p8), [#allocation7], 4294966272  ;;  %1317 = vmatprep.subr.bf16.mxu0 %v1594_v0  ;;  %1263 = vmatprep.mubr.msk.f32.mxu0 %vm1595_vm0, %v1596_v1  ;;  %v1318_v5 = vpack.c.bf16 %v244_v3, %v243_v2  ;;  %v246_v6 = vld [vmem:[#allocation6 + $0x18] sm:$0xff]  ;;  %vm247_vm1 = vcmask 261120   ;;  %s1597_s21 = smov 64   ;;  %s1598_s23 = smov 96  }
  0x6b   : > { %1266 = vmatprep.subr.mxu1 %v1596_v1  ;;  %1268 = vmatprep.mubr.msk.f32.mxu1 %vm1595_vm0, %v1596_v1  ;;  %v1321_v7 = vpack.c.bf16 %v246_v6, %v245_v4  ;;  %v242_v8 = vld [vmem:[%s209_s8] sm:$0xff]  ;;  %s1599_s27 = smov 88   ;;  %s1600_s30 = smov 120   ;;  %vm329_vm2 = vcmask 64512   ;;  %v322_v17 = vshrl.u32 %v321_v16, 7  ;;  %v324_v18 = vand.u32 127, %v321_v16 }
  0x6c   : > { %1319 = vmatpush3.bf16.msra.mxu0 %v1318_v5  ;;  %s1601_s5 = smov 80   ;;  %s1602_s6 = smov 72   ;;  %v1012_v16 = vld [vmem:[#allocation8 + $0x10] sm:$0xff]  ;;  %vm663_vm4 = vcmask 130112   ;;  %vm835_vm5 = vcmask 195712   ;;  %vm1007_vm6 = vcmask 261312  }
  0x6d   : > { %1320 = vmatprep.subr.bf16.mxu0 %v1594_v0  ;;  %vm325_vm3 = vcmp.ge.s32.totalorder %v322_v17, %v324_v18  ;;  %s1603_s26 = smov 112   ;;  %s1604_s10 = smov 104   ;;  %v1013_v17 = vld [vmem:[#allocation8 + $0x18] sm:$0xff] }
  0x6e   : > { %s1605_s24 = smov 56   ;;  %s1606_s20 = smov 48   ;;  %v1327_v18 = vpack.c.bf16 %v1013_v17, %v1012_v16 }
  0x6f   : > { %s1607_s28 = smov 40   ;;  %s1608_s11 = smov 8  }
  0x70   : > { %1322 = vmatpush3.bf16.msra.mxu0 %v1321_v7  ;;  %s1609_s12 = smov 16   ;;  %s1610_s7 = smov 24  }
  0x71   : > { %1286 = vmatprep.subr.mxu0 %v1596_v1  ;;  %p1965_p0 = scmp.ne.s32.totalorder %s1960_s13, 0 }
  0x73   : > { %1264 = vmatmul.mubr.msk.f32.vlgmr.msra.gmra.mrb[0].mxu0 %vm247_vm1, %v242_v8 }
  0x74   : > { %1288 = vmatprep.mubr.msk.f32.mxu0 %vm1595_vm0, %v1596_v1 }
 0x146   : > { %v1831_v9 = vpop.f32.mrb[0].mxu0 }
 0x147   : > { %416 = vrot.lane.b32.xlu1 %v1831_v9, %s1597_s21  ;;  %327 = vrot.lane.b32.xlu0 %v1831_v9, %s1598_s23  ;;  %v1265_v10 = vpop.f32.mrb[1].mxu0  ;;  %s1226_s23 = sshll.u32 %s1658_s19, 7 }
 0x14b   : > { %495 = vrot.lane.b32.xlu1 %v1831_v9, %s1599_s27  ;;  %s241_s27 = scalar_lea.vmem [#allocation9], %s1206_s25  ;;  %s1611_s25 = smov [#allocation9]  }
 0x14f   : > { %493 = vrot.lane.b32.xlu1 %v1831_v9, %s1600_s30  ;;  %s1109_s30 = sshll.u32 %s241_s27, 4  ;;  %s1904_s30 = int_to_ptr.vmem [resolvable:$true] %s1109_s30 }
 0x150   : > { %s1517_s19 = scalar_lea.vmem %s1904_s30, 128 }
 0x151   : > { %p1518_p11 = scmp.ne.s32.totalorder %s1904_s30, %s1517_s19 }
 0x153   : > { %667 = vrot.lane.b32.xlu1 %v1831_v9, %s1601_s5  ;;  %p1519_p1 = pnand %p1518_p11, %p1965_p0 }
 0x155   : > { %p1520_p3 = pneg %p1519_p1 }
 0x1b9   : > { %v417_v11 = vpop.permute.xlu1 %416  ;;  %v328_v12 = vpop.permute.xlu0 %327 }
 0x1ba   : > { %1267 = vmatpush3.xpose.msk.msra.mxu1 %vm329_vm2, %v328_v12 }
 0x1bb   : > { %1271 = vmatprep.subr.mxu1 %v1596_v1 }
 0x1bd   : > { %v496_v13 = vpop.permute.xlu1 %495  ;;  %1269 = vmatmul.mubr.msk.f32.vlgmr.msra.gmra.mrb[0].mxu1 %vm329_vm2, %v1831_v9 }
 0x1be   : > { %1272 = vmatpush3.msra.mxu1 %v417_v11  ;;  %1273 = vmatprep.mubr.msk.f32.mxu1 %vm1595_vm0, %v1596_v1 }
 0x1bf   : > { %1276 = vmatprep.subr.mxu1 %v1596_v1 }
 0x1c1   : > { %v494_v14 = vpop.permute.xlu1 %493 }
 0x1c5   : > { %v668_v15 = vpop.permute.xlu1 %667 }
 0x1c6   : > { %1287 = vmatpush3.xpose.msk.msra.mxu0 %vm329_vm2, %v668_v15 }
 0x1c7   : > { %1296 = vmatprep.subr.mxu0 %v1596_v1 }
 0x290   : > { %v400_v19 = vpop.f32.mrb[0].mxu1 }
 0x291   : > { %v404_v20 = vsel %vm325_vm3, %v400_v19, -1e+30  ;;  %v1270_v21 = vpop.f32.mrb[1].mxu1 }
 0x292   : > { %v405_v22 = vsel %vm329_vm2, %v404_v20, -inf }
 0x293   : > { %406 = vmax.xlane.f32.xlu0 %v405_v22 }
 0x2a9   : > { %839 = vrot.lane.b32.xlu0 %v1831_v9, %s1602_s6 }
 0x320   : > { %v407_v23 = vpop.xlane.xlu0 %406 }
 0x321   : > { %v408_v24 = vsub.f32 %v404_v20, %v407_v23 }
 0x323   : > { %v409_v25 = vmul.f32 1.442695, %v408_v24 }
 0x324   : > { %v840_v30 = vpop.permute.xlu0 %839 }
 0x325   : > { %1415 = vpow2.f32 %v409_v25 }
 0x32f   : > { %v1416_v26 = vpop.eup %1415 }
 0x330   : > { %v411_v27 = vsel %vm329_vm2, %v1416_v26, 0.0 }
 0x331   : > { %412 = vadd.xlane.f32.xlu1 %v411_v27  ;;  %v1223_v27 = vld [vmem:[%s1950_s3] ss:$0 sm:$0xff] }
 0x342   : > { %665 = vrot.lane.b32.xlu1 %v1831_v9, %s1603_s26  ;;  %s1902_s26 = scalar_lea.hbm %s1951_s4, %s1226_s23 }
 0x346   : > { %837 = vrot.lane.b32.xlu1 %v1831_v9, %s1604_s10  ;;  %s1096_s10 = scalar_lea.sflag [#allocation5], %s1806_s29 }
 0x3be   : > { %v413_v28 = vpop.xlane.xlu1 %412 }
 0x3bf   : > { %1417 = vrcp.f32 %v413_v28 }
 0x3c2   : > { %v666_v29 = vpop.permute.xlu1 %665 }
 0x3c3   : > { %1289 = vmatmul.mubr.msk.f32.vlgmr.msra.gmra.mrb[2].mxu0 %vm329_vm2, %v666_v29 }
 0x3c4   : > { %1297 = vmatpush3.xpose.msk.msra.mxu0 %vm329_vm2, %v840_v30  ;;  %1298 = vmatprep.mubr.msk.f32.mxu0 %vm1595_vm0, %v1596_v1 }
 0x3c5   : > { %1323 = vmatprep.subr.bf16.mxu0 %v1594_v0 }
 0x3c6   : > { %v838_v31 = vpop.permute.xlu1 %837 }
 0x3c7   : > { %1299 = vmatmul.mubr.msk.f32.vlgmr.msra.gmra.mrb[4].mxu0 %vm329_vm2, %v838_v31 }
 0x3c8   : > { %1314 = vmatprep.mubr.msk.f32.mxu0 %vm1595_vm0, %v1596_v1 }
 0x3c9   : > { %v1418_v32 = vpop.eup %1417 }
 0x3ca   : > { %v415_v33 = vmul.f32 %v1418_v32, %v1416_v26 }
 0x3cc   : > { %1274 = vmatmul.mubr.msk.f32.vlgmr.msra.gmra.mrb[2].mxu1 %vm329_vm2, %v415_v33 }
 0x3cd   : > { %1277 = vmatpush3.xpose.msk.msra.mxu1 %vm329_vm2, %v496_v13  ;;  %1278 = vmatprep.mubr.msk.f32.mxu1 %vm1595_vm0, %v1596_v1  ;;  %v1010_v13 = vld [vmem:[#allocation8] sm:$0xff] }
 0x3ce   : > { %1281 = vmatprep.subr.mxu1 %v1596_v1 }
 0x3d0   : > { %1279 = vmatmul.mubr.msk.f32.vlgmr.msra.gmra.mrb[4].mxu1 %vm329_vm2, %v494_v14  ;;  %v1011_v14 = vld [vmem:[#allocation8 + $0x8] sm:$0xff] }
 0x3d1   : > { %1283 = vmatprep.mubr.msk.f32.mxu1 %vm1595_vm0, %v1596_v1  ;;  %v1324_v15 = vpack.c.bf16 %v1011_v14, %v1010_v13 }
 0x3d3   : > { %1325 = vmatpush3.bf16.msra.mxu0 %v1324_v15 }
 0x3d4   : > { %1326 = vmatprep.subr.bf16.mxu0 %v1594_v0 }
 0x3d7   : > { %1328 = vmatpush3.bf16.msra.mxu0 %v1327_v18 }
 0x496   : > { %v739_v34 = vpop.f32.mrb[2].mxu0 }
 0x497   : > { %v743_v35 = vsel %vm325_vm3, %v739_v34, -1e+30  ;;  %v1290_v36 = vpop.f32.mrb[3].mxu0 }
 0x498   : > { %v744_v37 = vsel %vm329_vm2, %v743_v35, -inf }
 0x499   : > { %745 = vmax.xlane.f32.xlu0 %v744_v37 }
 0x49a   : > { %v911_v38 = vpop.f32.mrb[4].mxu0 }
 0x49b   : > { %v1300_v39 = vpop.f32.mrb[5].mxu0  ;;  %v915_v46 = vsel %vm325_vm3, %v911_v38, -1e+30 }
 0x49c   : > { %v916_v47 = vsel %vm329_vm2, %v915_v46, -inf }
 0x49f   : > { %v488_v40 = vpop.f32.mrb[2].mxu1 }
 0x4a0   : > { %492 = vst.msk [vmem:[#allocation2] sm:$0xff] %vm329_vm2, %v488_v40  ;;  %v1275_v41 = vpop.f32.mrb[3].mxu1 }
 0x4a3   : > { %v567_v42 = vpop.f32.mrb[4].mxu1 }
 0x4a4   : > { %v571_v43 = vsel %vm325_vm3, %v567_v42, -1e+30  ;;  %v1280_v44 = vpop.f32.mrb[5].mxu1 }
 0x4a5   : > { %v572_v45 = vsel %vm329_vm2, %v571_v43, -inf }
 0x4a6   : > { %573 = vmax.xlane.f32.xlu1 %v572_v45 }
 0x4aa   : > { %917 = vmax.xlane.f32.xlu1 %v916_v47 }
 0x526   : > { %v746_v48 = vpop.xlane.xlu0 %745 }
 0x527   : > { %v747_v49 = vsub.f32 %v743_v35, %v746_v48 }
 0x529   : > { %v748_v50 = vmul.f32 1.442695, %v747_v49 }
 0x52b   : > { %1419 = vpow2.f32 %v748_v50 }
 0x533   : > { %v574_v51 = vpop.xlane.xlu1 %573 }
 0x534   : > { %v575_v59 = vsub.f32 %v571_v43, %v574_v51 }
 0x535   : > { %v1420_v52 = vpop.eup %1419 }
 0x536   : > { %v750_v53 = vsel %vm329_vm2, %v1420_v52, 0.0  ;;  %v576_v60 = vmul.f32 1.442695, %v575_v59 }
 0x537   : > { %751 = vadd.xlane.f32.xlu1 %v750_v53  ;;  %v918_v54 = vpop.xlane.xlu1 %917 }
 0x538   : > { %v919_v55 = vsub.f32 %v915_v46, %v918_v54 }
 0x53a   : > { %v920_v56 = vmul.f32 1.442695, %v919_v55 }
 0x53c   : > { %1421 = vpow2.f32 %v920_v56 }
 0x53d   : > { %1423 = vpow2.f32 %v576_v60 }
 0x546   : > { %v1422_v57 = vpop.eup %1421 }
 0x547   : > { %v922_v58 = vsel %vm329_vm2, %v1422_v57, 0.0  ;;  %v1424_v61 = vpop.eup %1423 }
 0x548   : > { %583 = vrot.lane.b32.xlu1 %v1831_v9, %s1605_s24  ;;  %923 = vadd.xlane.f32.xlu0 %v922_v58  ;;  %v578_v62 = vsel %vm329_vm2, %v1424_v61, 0.0  ;;  %s1521_s24 = sshll.u32 %s1611_s25, 4  ;;  %s1522_s24 = int_to_ptr.vmem [resolvable:$false] %s1521_s24 }
 0x549   : > { %p1524_p7 = scmp.lt.s32.totalorder %s1904_s30, %s1522_s24 }
 0x55e   : > { %755 = vrot.lane.b32.xlu0 %v1831_v9, %s1606_s20  ;;  %s1523_s20 = scalar_lea.vmem %s1522_s24, 256 }
 0x55f   : > { %p1525_p9 = scmp.lt.s32.totalorder %s1523_s20, %s1517_s19 }
 0x561   : > { %p1526_p12 = por %p1525_p9, %p1524_p7 }
 0x563   : > { %p1527_p2 = pnand %p1526_p12, %p1520_p3 }
 0x56c   : > { %579 = vadd.xlane.f32.xlu1 %v578_v62 }
 0x57d   : > { %927 = vrot.lane.b32.xlu1 %v1831_v9, %s1607_s28 }
 0x5c4   : > { %v752_v63 = vpop.xlane.xlu1 %751 }
 0x5c8   : > { %v584_v2 = vpop.permute.xlu1 %583 }
 0x5c9   : > { %1282 = vmatpush3.msra.mxu1 %v584_v2 }
 0x5ca   : > { %1291 = vmatprep.subr.mxu1 %v1596_v1 }
 0x5d5   : > { %v924_v4 = vpop.xlane.xlu0 %923 }
 0x5d9   : > { %v756_v8 = vpop.permute.xlu0 %755 }
 0x5f9   : > { %v580_v3 = vpop.xlane.xlu1 %579 }
 0x5fa   : > { %1425 = vrcp.f32 %v580_v3 }
 0x5fb   : > { %1427 = vrcp.f32 %v752_v63 }
 0x5fc   : > { %1429 = vrcp.f32 %v924_v4 }
 0x5fd   : > { %v928_v11 = vpop.permute.xlu1 %927 }
 0x604   : > { %v1426_v5 = vpop.eup %1425 }
 0x605   : > { %v582_v6 = vmul.f32 %v1426_v5, %v1424_v61  ;;  %v1428_v7 = vpop.eup %1427 }
 0x606   : > { %v754_v9 = vmul.f32 %v1428_v7, %v1420_v52  ;;  %v1430_v10 = vpop.eup %1429 }
 0x607   : > { %1284 = vmatmul.mubr.msk.f32.vlgmr.msra.gmra.mrb[6].mxu1 %vm329_vm2, %v582_v6  ;;  %v926_v12 = vmul.f32 %v1430_v10, %v1422_v57 }
 0x608   : > { %1292 = vmatpush3.msra.mxu1 %v756_v8  ;;  %1293 = vmatprep.mubr.msk.f32.mxu1 %vm1595_vm0, %v1596_v1 }
 0x609   : > { %1301 = vmatprep.subr.mxu1 %v1596_v1 }
 0x60b   : > { %1294 = vmatmul.mubr.msk.f32.vlgmr.msra.gmra.mrb[8].mxu1 %vm329_vm2, %v754_v9 }
 0x60c   : > { %1302 = vmatpush3.msra.mxu1 %v928_v11  ;;  %1303 = vmatprep.mubr.msk.f32.mxu1 %vm1595_vm0, %v1596_v1 }
 0x60f   : > { %1304 = vmatmul.mubr.msk.f32.vlgmr.msra.gmra.mrb[10].mxu1 %vm329_vm2, %v926_v12 }
 0x6da   : > { %v655_v19 = vpop.f32.mrb[6].mxu1 }
 0x6db   : > { %660 = vrot.lane.b32.xlu1 %v655_v19, %s1608_s11  ;;  %v1285_v20 = vpop.f32.mrb[7].mxu1 }
 0x6de   : > { %v827_v21 = vpop.f32.mrb[8].mxu1 }
 0x6df   : > { %832 = vrot.lane.b32.xlu0 %v827_v21, %s1609_s12  ;;  %v1295_v1 = vpop.f32.mrb[9].mxu1 }
 0x6e2   : > { %v999_v22 = vpop.f32.mrb[10].mxu1 }
 0x6e3   : > { %1004 = vrot.lane.b32.xlu1 %v999_v22, %s1610_s7  ;;  %v1305_v23 = vpop.f32.mrb[11].mxu1 }
 0x74d   : > { %v661_v24 = vpop.permute.xlu1 %660 }
 0x74e   : > { %664 = vst.msk [vmem:[#allocation2] sm:$0xff] %vm663_vm4, %v661_v24 }
 0x751   : > { %v833_v0 = vpop.permute.xlu0 %832 }
 0x752   : > { %836 = vst.msk [vmem:[#allocation2] sm:$0xff] %vm835_vm5, %v833_v0 }
 0x755   : > { %v1005_v25 = vpop.permute.xlu1 %1004 }
 0x756   : > { %1008 = vst.msk [vmem:[#allocation2] sm:$0xff] %vm1007_vm6, %v1005_v25 }
 0x75d   : > { %v1009_v26 = vld [vmem:[#allocation2] sm:$0xff] }
 0x75e   : > { %1315 = vmatmul.mubr.msk.f32.vlgmr.msra.gmra.mrb[6].mxu0 %vm247_vm1, %v1009_v26 }
 0x831   : > { %v1090_v28 = vpop.f32.mrb[6].mxu0 }
 0x832   : > { %v1091_v29 = vadd.f32 %v1223_v27, %v1090_v28  ;;  %v1316_v30 = vpop.f32.mrb[7].mxu0 }
 0x834   : > { %1094 = vst.msk [vmem:[%s241_s27] sm:$0xff] %vm247_vm1, %v1091_v29 }
 0x835   : > { %1530 = shalt.err (!%p1527_p2)
}
 0x836   : > { %s1531_s29 = scalar_lea.hbm %s1902_s26, 128  ;;  %s1535_s12 = scalar_lea.hbm %s1951_s4, 256 }
 0x837   : > { %p1532_p13 = scmp.ne.s32.totalorder %s1902_s26, %s1531_s29  ;;  %p1536_p4 = scmp.lt.u32.totalorder %s1902_s26, %s1951_s4 }
 0x838   : > { %p1537_p5 = scmp.lt.u32.totalorder %s1535_s12, %s1531_s29  ;;  %p1539_p11 = scmp.lt.u32.totalorder %s1531_s29, %s1902_s26 }
 0x839   : > { %p1533_p6 = pnand %p1532_p13, %p1965_p0 }
 0x83a   : > { %p1538_p8 = por %p1537_p5, %p1536_p4 }
 0x83b   : > { %p1534_p10 = pneg %p1533_p6 }
 0x83c   : > { %p1540_p1 = por %p1539_p11, %p1538_p8 }
 0x83e   : > { %p1541_p3 = pnand %p1540_p1, %p1534_p10 }
 0x840   : > { %1544 = shalt.err (!%p1541_p3)
}
 0x841   : > { %1339 = dma.vmem_to_hbm [thread:$0]  (%p1965_p0), %s1904_s30, 128, %s1902_s26, %s1096_s10  }
 0x842 PF: > { %s1121_s21 = sand.u32 1, %s1575_s15   ;;  %p1966_p7 = scmp.ne.s32.totalorder %s1956_s22, 0 }
 0x843   : > { %p1967_p9 = scmp.ge.s32.totalorder %s1587_s18, 2  ;;  %s1122_s23 = scalar_lea.sflag [#allocation5], %s1121_s21 }
 0x845   : > { %p1353_p12 = pnand %p1967_p9, %p1966_p7 }
 0x847   : > { %1570 = dma.done.wait (!%p1353_p12), %s1122_s23, 128  }
 0x848   : > { %1572 = vsyncadd (!%p1353_p12), %s1122_s23, 4294967168  ;;  %p18_p2 = scmp.ge.s32.totalorder %s1747_s9, 4   ;;  %s1968_s15 = smov %s1579_s16 }
 0x849   : > { %s1969_s16 = smov %s1583_s17  ;;  %s1970_s17 = smov %s1763_s14 }
 0x84a   : > { %s1971_s18 = smov %s1747_s9  ;;  %20 = sbr.rel (!%p18_p2) target bundleno = 6 (0x6), region = 89 }
 0x851   :  { %1127 = vsyncpa [#allocation4], 1 }
 0x852   :  { %1129 = vsyncpa [#allocation4 + $0x1], 1 }
 0x853   :  { %1130 = vsyncpa [#allocation7], 1 }
 0x854   :  { %1131 = vsyncpa [#allocation5], 1 }
 0x855   :  { %1133 = vsyncpa [#allocation5 + $0x1], 1 }

</bundles_post_ra>
